<compile_context>
chip_gen: v7x
topology: tpu7x:2x2x1
jax: 0.10.0
libtpu: 0.0.40
codegen_flags: <defaults>
</compile_context>

<pallas_src>
import math

import jax
import jax.numpy as jnp
from jax.experimental import pallas as pl
from jax.experimental.pallas import tpu as pltpu


def make_generator_kernel(latent_size: int,
                          eps: float = 1e-5,
                          negative_slope: float = 0.2):
    """Fused forward kernel for GeneratorSigmoidSTE (packed-param layout)."""

    def kernel(z_ref, w_ref, vec_ref, out_ref, avg_ref):
        batch = z_ref.shape[0]
        inv_b = 1.0 / float(batch)

        def hidden_block(x, w, layer):
            row = 3 * layer
            b = vec_ref[row + 0:row + 1, :]      # (1, 128) bias   (zero-padded)
            g = vec_ref[row + 1:row + 2, :]      # (1, 128) gamma  (zero-padded)
            be = vec_ref[row + 2:row + 3, :]     # (1, 128) beta   (zero-padded)

            # Linear (MXU, f32 accumulation)
            h = jnp.dot(x, w, preferred_element_type=jnp.float32) + b
            # LeakyReLU(0.2): slope < 1, so max(h, slope*h) == leaky_relu(h)
            h = jnp.maximum(h, negative_slope * h)
            # One-pass BatchNorm statistics (train mode, biased variance):
            # both sublane reductions issue back-to-back.
            s1 = jnp.sum(h, axis=0, keepdims=True)
            s2 = jnp.sum(h * h, axis=0, keepdims=True)
            mu = s1 * inv_b
            var = s2 * inv_b - mu * mu
            # Folded affine: 2 VPU ops per element instead of 4.
            scale = g * jax.lax.rsqrt(var + eps)
            shift = be - mu * scale
            return h * scale + shift

        h = z_ref[...].astype(jnp.float32)
        # Layer 1: only the first `latent_size` rows of the padded weight slab are real;
        # the slice is an aligned sublane-tile block (latent_size = 8 here).
        h = hidden_block(h, w_ref[0, :latent_size, :], 0)
        h = hidden_block(h, w_ref[1], 1)
        h = hidden_block(h, w_ref[2], 2)

        # Final layer: Linear -> ValueExtractor -> Sigmoid -> BinaryStraightThrough(0.5)
        logits = (jnp.dot(h, w_ref[3], preferred_element_type=jnp.float32)
                  + vec_ref[9:10, :])
        # ValueExtractor side output: batch mean of the final linear pre-activation.
        avg_ref[...] = jnp.sum(logits, axis=0, keepdims=True) * inv_b
        # sigmoid(x) > 0.5  <=>  x > 0 (sigmoid strictly monotone, sigmoid(0) = 0.5,
        # PyTorch comparison is strict) -> no exp/reciprocal needed.
        out_ref[...] = jnp.where(logits > 0.0, 1.0, 0.0).astype(out_ref.dtype)

    return kernel


def pack_params(params, latent_size: int, img_size: int):
    """Pack the 14 per-layer tensors into 2 lane-dense slabs (done once per step)."""
    (w1, b1, g1, be1,
     w2, b2, g2, be2,
     w3, b3, g3, be3,
     w4, b4) = params
    P = img_size  # pad every weight / vector to 128 lanes (full MXU / vst tiles)

    def pad_w(w):
        out = jnp.zeros((P, P), jnp.float32)
        return out.at[:w.shape[0], :w.shape[1]].set(w.astype(jnp.float32))

    def pad_v(v):
        v = jnp.asarray(v, jnp.float32).reshape(1, -1)
        out = jnp.zeros((1, P), jnp.float32)
        return out.at[:, :v.shape[1]].set(v)

    w_slab = jnp.stack([pad_w(w1), pad_w(w2), pad_w(w3), pad_w(w4)], axis=0)
    # Row layout: [b1,g1,be1, b2,g2,be2, b3,g3,be3, b4]. Zero padding (incl. gamma = 0)
    # keeps all padding lanes exactly 0 through every block.
    vec_slab = jnp.concatenate(
        [pad_v(b1), pad_v(g1), pad_v(be1),
         pad_v(b2), pad_v(g2), pad_v(be2),
         pad_v(b3), pad_v(g3), pad_v(be3),
         pad_v(b4)], axis=0)
    return w_slab, vec_slab


def generator_sigmoid_ste(z: jax.Array, w_slab: jax.Array, vec_slab: jax.Array,
                          latent_size: int):
    """Forward. Returns (binarized (B, img_size), avg_mask value (1, img_size))."""
    B = z.shape[0]
    img_size = w_slab.shape[-1]

    def vmem_spec():
        return pl.BlockSpec(memory_space=pltpu.MemorySpace.VMEM)

    flops = 2 * B * (latent_size * img_size + 3 * img_size * img_size) + 12 * B * img_size
    bytes_accessed = 4 * (z.size + w_slab.size + vec_slab.size + B * img_size + img_size)

    binarized, avg = pl.pallas_call(
        make_generator_kernel(latent_size),
        out_shape=(
            jax.ShapeDtypeStruct((B, img_size), jnp.float32),
            jax.ShapeDtypeStruct((1, img_size), jnp.float32),
        ),
        in_specs=[vmem_spec(), vmem_spec(), vmem_spec()],
        out_specs=(vmem_spec(), vmem_spec()),
        cost_estimate=pl.CostEstimate(flops=flops, transcendentals=0,
                                      bytes_accessed=bytes_accessed),
    )(z, w_slab, vec_slab)
    return binarized, avg


def generator_sigmoid_ste_ref(z: jax.Array, params):
    """Pure-JAX reference mirroring the PyTorch forward (train-mode BatchNorm)."""
    (w1, b1, g1, be1,
     w2, b2, g2, be2,
     w3, b3, g3, be3,
     w4, b4) = params

    def hidden_block(x, w, b, g, be):
        h = x @ w + b
        h = jnp.where(h >= 0.0, h, 0.2 * h)
        mu = jnp.mean(h, axis=0, keepdims=True)
        var = jnp.mean(jnp.square(h - mu), axis=0, keepdims=True)
        h = (h - mu) * jax.lax.rsqrt(var + 1e-5)
        return h * g + be

    h = hidden_block(z, w1, b1, g1, be1)
    h = hidden_block(h, w2, b2, g2, be2)
    h = hidden_block(h, w3, b3, g3, be3)
    logits = h @ w4 + b4
    avg = jnp.mean(logits, axis=0, keepdims=True)          # ValueExtractor value
    # (sigmoid(logits) > 0.5) is exactly (logits > 0): sigmoid strictly monotone,
    # sigmoid(0) = 0.5, PyTorch comparison is strict.
    binarized = jnp.where(logits > 0.0, 1.0, 0.0)          # BinaryStraightThrough fwd value
    return binarized, avg, logits


if __name__ == "__main__":
    # Config consistent with the module: latent_size=8, img_size=128 =>
    # increase = log_4(16) = 2, widths 8 -> 16 -> 32 -> 64 -> 128. Batch = 32.
    latent_size, img_size, batch = 8, 128, 32
    amount_layers = 4
    rel_size = int(img_size / latent_size)
    increase = math.log(rel_size, amount_layers)
    dims = [max(round(increase ** k * latent_size), 1) for k in range(amount_layers)]
    dims = dims + [img_size]                                # [8, 16, 32, 64, 128]

    key = jax.random.PRNGKey(0)
    params = []
    # Three hidden blocks: Linear (in,out) + bias + BatchNorm gamma/beta, all (1, out).
    for li in range(3):
        fan_in, fan_out = dims[li], dims[li + 1]
        key, kw, kb, kg, kbe = jax.random.split(key, 5)
        params.append(jax.random.normal(kw, (fan_in, fan_out), jnp.float32)
                      / math.sqrt(fan_in))
        params.append(0.1 * jax.random.normal(kb, (1, fan_out), jnp.float32))
        params.append(1.0 + 0.1 * jax.random.normal(kg, (1, fan_out), jnp.float32))
        params.append(0.1 * jax.random.normal(kbe, (1, fan_out), jnp.float32))
    # Final layer: Linear(dims[3] -> img_size) + bias.
    key, kw, kb, kz = jax.random.split(key, 4)
    params.append(jax.random.normal(kw, (dims[3], img_size), jnp.float32)
                  / math.sqrt(dims[3]))
    params.append(0.1 * jax.random.normal(kb, (1, img_size), jnp.float32))
    params = tuple(params)

    z = jax.random.normal(kz, (batch, latent_size), dtype=jnp.float32)

    # Pack params once (they are per-step constants in a real training loop).
    w_slab, vec_slab = pack_params(params, latent_size, img_size)

    out_bin, out_avg = generator_sigmoid_ste(z, w_slab, vec_slab, latent_size)
    out_bin = jax.block_until_ready(out_bin)
    out_avg = jax.block_until_ready(out_avg)

    ref_bin, ref_avg, ref_logits = generator_sigmoid_ste_ref(z, params)

    assert out_bin.shape == (batch, img_size), out_bin.shape
    assert out_avg.shape == (1, img_size), out_avg.shape
    # Binarized output must be exactly {0, 1}.
    assert bool(jnp.all((out_bin == 0.0) | (out_bin == 1.0))), "non-binary output"
    # Kernel uses one-pass BN stats + folded affine, so its logits may differ from the
    # reference by ~1e-5; require exact bit agreement except where the reference logit
    # sits essentially on the sigmoid(x)=0.5 decision boundary.
    mismatch = out_bin != ref_bin
    near_boundary = jnp.abs(ref_logits) < 1e-2
    assert bool(jnp.all(jnp.logical_or(~mismatch, near_boundary))), \
        "binarized output mismatch vs reference"
    assert bool(jnp.allclose(out_avg, ref_avg, atol=2e-3, rtol=2e-3)), "avg_mask mismatch"

    print("KERNEL_OK")
</pallas_src>

<mosaic_0001>
module attributes {stable_mosaic.version = 11 : i64} {
  func.func @kernel(%arg0: memref<32x8xf32, #tpu.memory_space<vmem>>, %arg1: memref<4x128x128xf32, #tpu.memory_space<vmem>>, %arg2: memref<10x128xf32, #tpu.memory_space<vmem>>, %arg3: memref<32x128xf32, #tpu.memory_space<vmem>>, %arg4: memref<1x128xf32, #tpu.memory_space<vmem>>) attributes {dimension_semantics = [], scalar_prefetch = 0 : i64, scratch_operands = 0 : i64, tpu.core_type = #tpu.core_type<tc>} {
    %c0 = arith.constant 0 : index
    %c0_0 = arith.constant 0 : index
    %0 = vector.load %arg0[%c0, %c0_0] : memref<32x8xf32, #tpu.memory_space<vmem>>, vector<32x8xf32>
    %c0_1 = arith.constant 0 : index
    %c0_2 = arith.constant 0 : index
    %c0_3 = arith.constant 0 : index
    %1 = vector.load %arg1[%c0_1, %c0_2, %c0_3] : memref<4x128x128xf32, #tpu.memory_space<vmem>>, vector<1x8x128xf32>
    %2 = vector.shape_cast %1 : vector<1x8x128xf32> to vector<8x128xf32>
    %c0_4 = arith.constant 0 : index
    %c0_5 = arith.constant 0 : index
    %3 = vector.load %arg2[%c0_4, %c0_5] : memref<10x128xf32, #tpu.memory_space<vmem>>, vector<1x128xf32>
    %c1 = arith.constant 1 : index
    %c0_6 = arith.constant 0 : index
    %4 = vector.load %arg2[%c1, %c0_6] : memref<10x128xf32, #tpu.memory_space<vmem>>, vector<1x128xf32>
    %c2 = arith.constant 2 : index
    %c0_7 = arith.constant 0 : index
    %5 = vector.load %arg2[%c2, %c0_7] : memref<10x128xf32, #tpu.memory_space<vmem>>, vector<1x128xf32>
    %cst = arith.constant dense<0.000000e+00> : vector<32x128xf32>
    %6 = tpu.matmul %0, %2, %cst {dimension_numbers = #tpu.dot_dimension_numbers<[1], [0], [0], [1], [0, 0, 1, 1], [], []>} : vector<32x8xf32>, vector<8x128xf32>, vector<32x128xf32> -> vector<32x128xf32>
    %7 = vector.broadcast %3 : vector<1x128xf32> to vector<32x128xf32>
    %8 = arith.addf %6, %7 : vector<32x128xf32>
    %cst_8 = arith.constant 2.000000e-01 : f32
    %9 = vector.broadcast %cst_8 : f32 to vector<32x128xf32>
    %10 = arith.mulf %9, %8 : vector<32x128xf32>
    %11 = arith.maximumf %8, %10 : vector<32x128xf32>
    %cst_9 = arith.constant dense<0.000000e+00> : vector<128xf32>
    %12 = vector.multi_reduction <add>, %11, %cst_9 [0] : vector<32x128xf32> to vector<128xf32>
    %13 = vector.shape_cast %12 : vector<128xf32> to vector<1x128xf32>
    %14 = arith.mulf %11, %11 : vector<32x128xf32>
    %cst_10 = arith.constant dense<0.000000e+00> : vector<128xf32>
    %15 = vector.multi_reduction <add>, %14, %cst_10 [0] : vector<32x128xf32> to vector<128xf32>
    %16 = vector.shape_cast %15 : vector<128xf32> to vector<1x128xf32>
    %cst_11 = arith.constant 3.125000e-02 : f32
    %17 = vector.broadcast %cst_11 : f32 to vector<1x128xf32>
    %18 = arith.mulf %13, %17 : vector<1x128xf32>
    %cst_12 = arith.constant 3.125000e-02 : f32
    %19 = vector.broadcast %cst_12 : f32 to vector<1x128xf32>
    %20 = arith.mulf %16, %19 : vector<1x128xf32>
    %21 = arith.mulf %18, %18 : vector<1x128xf32>
    %22 = arith.subf %20, %21 : vector<1x128xf32>
    %cst_13 = arith.constant 9.99999974E-6 : f32
    %23 = vector.broadcast %cst_13 : f32 to vector<1x128xf32>
    %24 = arith.addf %22, %23 : vector<1x128xf32>
    %25 = math.rsqrt %24 : vector<1x128xf32>
    %26 = arith.mulf %4, %25 : vector<1x128xf32>
    %27 = arith.mulf %18, %26 : vector<1x128xf32>
    %28 = arith.subf %5, %27 : vector<1x128xf32>
    %29 = vector.broadcast %26 : vector<1x128xf32> to vector<32x128xf32>
    %30 = arith.mulf %11, %29 : vector<32x128xf32>
    %31 = vector.broadcast %28 : vector<1x128xf32> to vector<32x128xf32>
    %32 = arith.addf %30, %31 : vector<32x128xf32>
    %c1_14 = arith.constant 1 : index
    %c0_15 = arith.constant 0 : index
    %c0_16 = arith.constant 0 : index
    %33 = vector.load %arg1[%c1_14, %c0_15, %c0_16] : memref<4x128x128xf32, #tpu.memory_space<vmem>>, vector<1x128x128xf32>
    %34 = vector.shape_cast %33 : vector<1x128x128xf32> to vector<128x128xf32>
    %c3 = arith.constant 3 : index
    %c0_17 = arith.constant 0 : index
    %35 = vector.load %arg2[%c3, %c0_17] : memref<10x128xf32, #tpu.memory_space<vmem>>, vector<1x128xf32>
    %c4 = arith.constant 4 : index
    %c0_18 = arith.constant 0 : index
    %36 = vector.load %arg2[%c4, %c0_18] : memref<10x128xf32, #tpu.memory_space<vmem>>, vector<1x128xf32>
    %c5 = arith.constant 5 : index
    %c0_19 = arith.constant 0 : index
    %37 = vector.load %arg2[%c5, %c0_19] : memref<10x128xf32, #tpu.memory_space<vmem>>, vector<1x128xf32>
    %cst_20 = arith.constant dense<0.000000e+00> : vector<32x128xf32>
    %38 = tpu.matmul %32, %34, %cst_20 {dimension_numbers = #tpu.dot_dimension_numbers<[1], [0], [0], [1], [0, 0, 1, 1], [], []>} : vector<32x128xf32>, vector<128x128xf32>, vector<32x128xf32> -> vector<32x128xf32>
    %39 = vector.broadcast %35 : vector<1x128xf32> to vector<32x128xf32>
    %40 = arith.addf %38, %39 : vector<32x128xf32>
    %cst_21 = arith.constant 2.000000e-01 : f32
    %41 = vector.broadcast %cst_21 : f32 to vector<32x128xf32>
    %42 = arith.mulf %41, %40 : vector<32x128xf32>
    %43 = arith.maximumf %40, %42 : vector<32x128xf32>
    %cst_22 = arith.constant dense<0.000000e+00> : vector<128xf32>
    %44 = vector.multi_reduction <add>, %43, %cst_22 [0] : vector<32x128xf32> to vector<128xf32>
    %45 = vector.shape_cast %44 : vector<128xf32> to vector<1x128xf32>
    %46 = arith.mulf %43, %43 : vector<32x128xf32>
    %cst_23 = arith.constant dense<0.000000e+00> : vector<128xf32>
    %47 = vector.multi_reduction <add>, %46, %cst_23 [0] : vector<32x128xf32> to vector<128xf32>
    %48 = vector.shape_cast %47 : vector<128xf32> to vector<1x128xf32>
    %cst_24 = arith.constant 3.125000e-02 : f32
    %49 = vector.broadcast %cst_24 : f32 to vector<1x128xf32>
    %50 = arith.mulf %45, %49 : vector<1x128xf32>
    %cst_25 = arith.constant 3.125000e-02 : f32
    %51 = vector.broadcast %cst_25 : f32 to vector<1x128xf32>
    %52 = arith.mulf %48, %51 : vector<1x128xf32>
    %53 = arith.mulf %50, %50 : vector<1x128xf32>
    %54 = arith.subf %52, %53 : vector<1x128xf32>
    %cst_26 = arith.constant 9.99999974E-6 : f32
    %55 = vector.broadcast %cst_26 : f32 to vector<1x128xf32>
    %56 = arith.addf %54, %55 : vector<1x128xf32>
    %57 = math.rsqrt %56 : vector<1x128xf32>
    %58 = arith.mulf %36, %57 : vector<1x128xf32>
    %59 = arith.mulf %50, %58 : vector<1x128xf32>
    %60 = arith.subf %37, %59 : vector<1x128xf32>
    %61 = vector.broadcast %58 : vector<1x128xf32> to vector<32x128xf32>
    %62 = arith.mulf %43, %61 : vector<32x128xf32>
    %63 = vector.broadcast %60 : vector<1x128xf32> to vector<32x128xf32>
    %64 = arith.addf %62, %63 : vector<32x128xf32>
    %c2_27 = arith.constant 2 : index
    %c0_28 = arith.constant 0 : index
    %c0_29 = arith.constant 0 : index
    %65 = vector.load %arg1[%c2_27, %c0_28, %c0_29] : memref<4x128x128xf32, #tpu.memory_space<vmem>>, vector<1x128x128xf32>
    %66 = vector.shape_cast %65 : vector<1x128x128xf32> to vector<128x128xf32>
    %c6 = arith.constant 6 : index
    %c0_30 = arith.constant 0 : index
    %67 = vector.load %arg2[%c6, %c0_30] : memref<10x128xf32, #tpu.memory_space<vmem>>, vector<1x128xf32>
    %c7 = arith.constant 7 : index
    %c0_31 = arith.constant 0 : index
    %68 = vector.load %arg2[%c7, %c0_31] : memref<10x128xf32, #tpu.memory_space<vmem>>, vector<1x128xf32>
    %c8 = arith.constant 8 : index
    %c0_32 = arith.constant 0 : index
    %69 = vector.load %arg2[%c8, %c0_32] : memref<10x128xf32, #tpu.memory_space<vmem>>, vector<1x128xf32>
    %cst_33 = arith.constant dense<0.000000e+00> : vector<32x128xf32>
    %70 = tpu.matmul %64, %66, %cst_33 {dimension_numbers = #tpu.dot_dimension_numbers<[1], [0], [0], [1], [0, 0, 1, 1], [], []>} : vector<32x128xf32>, vector<128x128xf32>, vector<32x128xf32> -> vector<32x128xf32>
    %71 = vector.broadcast %67 : vector<1x128xf32> to vector<32x128xf32>
    %72 = arith.addf %70, %71 : vector<32x128xf32>
    %cst_34 = arith.constant 2.000000e-01 : f32
    %73 = vector.broadcast %cst_34 : f32 to vector<32x128xf32>
    %74 = arith.mulf %73, %72 : vector<32x128xf32>
    %75 = arith.maximumf %72, %74 : vector<32x128xf32>
    %cst_35 = arith.constant dense<0.000000e+00> : vector<128xf32>
    %76 = vector.multi_reduction <add>, %75, %cst_35 [0] : vector<32x128xf32> to vector<128xf32>
    %77 = vector.shape_cast %76 : vector<128xf32> to vector<1x128xf32>
    %78 = arith.mulf %75, %75 : vector<32x128xf32>
    %cst_36 = arith.constant dense<0.000000e+00> : vector<128xf32>
    %79 = vector.multi_reduction <add>, %78, %cst_36 [0] : vector<32x128xf32> to vector<128xf32>
    %80 = vector.shape_cast %79 : vector<128xf32> to vector<1x128xf32>
    %cst_37 = arith.constant 3.125000e-02 : f32
    %81 = vector.broadcast %cst_37 : f32 to vector<1x128xf32>
    %82 = arith.mulf %77, %81 : vector<1x128xf32>
    %cst_38 = arith.constant 3.125000e-02 : f32
    %83 = vector.broadcast %cst_38 : f32 to vector<1x128xf32>
    %84 = arith.mulf %80, %83 : vector<1x128xf32>
    %85 = arith.mulf %82, %82 : vector<1x128xf32>
    %86 = arith.subf %84, %85 : vector<1x128xf32>
    %cst_39 = arith.constant 9.99999974E-6 : f32
    %87 = vector.broadcast %cst_39 : f32 to vector<1x128xf32>
    %88 = arith.addf %86, %87 : vector<1x128xf32>
    %89 = math.rsqrt %88 : vector<1x128xf32>
    %90 = arith.mulf %68, %89 : vector<1x128xf32>
    %91 = arith.mulf %82, %90 : vector<1x128xf32>
    %92 = arith.subf %69, %91 : vector<1x128xf32>
    %93 = vector.broadcast %90 : vector<1x128xf32> to vector<32x128xf32>
    %94 = arith.mulf %75, %93 : vector<32x128xf32>
    %95 = vector.broadcast %92 : vector<1x128xf32> to vector<32x128xf32>
    %96 = arith.addf %94, %95 : vector<32x128xf32>
    %c3_40 = arith.constant 3 : index
    %c0_41 = arith.constant 0 : index
    %c0_42 = arith.constant 0 : index
    %97 = vector.load %arg1[%c3_40, %c0_41, %c0_42] : memref<4x128x128xf32, #tpu.memory_space<vmem>>, vector<1x128x128xf32>
    %98 = vector.shape_cast %97 : vector<1x128x128xf32> to vector<128x128xf32>
    %cst_43 = arith.constant dense<0.000000e+00> : vector<32x128xf32>
    %99 = tpu.matmul %96, %98, %cst_43 {dimension_numbers = #tpu.dot_dimension_numbers<[1], [0], [0], [1], [0, 0, 1, 1], [], []>} : vector<32x128xf32>, vector<128x128xf32>, vector<32x128xf32> -> vector<32x128xf32>
    %c9 = arith.constant 9 : index
    %c0_44 = arith.constant 0 : index
    %100 = vector.load %arg2[%c9, %c0_44] : memref<10x128xf32, #tpu.memory_space<vmem>>, vector<1x128xf32>
    %101 = vector.broadcast %100 : vector<1x128xf32> to vector<32x128xf32>
    %102 = arith.addf %99, %101 : vector<32x128xf32>
    %cst_45 = arith.constant dense<0.000000e+00> : vector<128xf32>
    %103 = vector.multi_reduction <add>, %102, %cst_45 [0] : vector<32x128xf32> to vector<128xf32>
    %104 = vector.shape_cast %103 : vector<128xf32> to vector<1x128xf32>
    %cst_46 = arith.constant 3.125000e-02 : f32
    %105 = vector.broadcast %cst_46 : f32 to vector<1x128xf32>
    %106 = arith.mulf %104, %105 : vector<1x128xf32>
    %c0_47 = arith.constant 0 : index
    %c0_48 = arith.constant 0 : index
    %107 = vector.load %arg4[%c0_47, %c0_48] : memref<1x128xf32, #tpu.memory_space<vmem>>, vector<1x128xf32>
    tpu.vector_store %arg4[%c0_47, %c0_48], %106 {strides = array<i32>} : memref<1x128xf32, #tpu.memory_space<vmem>>, vector<1x128xf32>,
    %cst_49 = arith.constant 0.000000e+00 : f32
    %108 = vector.broadcast %cst_49 : f32 to vector<32x128xf32>
    %109 = arith.cmpf ogt, %102, %108 : vector<32x128xf32>
    %cst_50 = arith.constant 1.000000e+00 : f32
    %cst_51 = arith.constant 0.000000e+00 : f32
    %110 = vector.broadcast %cst_50 : f32 to vector<32x128xf32>
    %111 = vector.broadcast %cst_51 : f32 to vector<32x128xf32>
    %112 = arith.select %109, %110, %111 : vector<32x128xi1>, vector<32x128xf32>
    %c0_52 = arith.constant 0 : index
    %c0_53 = arith.constant 0 : index
    %113 = vector.load %arg3[%c0_52, %c0_53] : memref<32x128xf32, #tpu.memory_space<vmem>>, vector<32x128xf32>
    tpu.vector_store %arg3[%c0_52, %c0_53], %112 {strides = array<i32>} : memref<32x128xf32, #tpu.memory_space<vmem>>, vector<32x128xf32>,
    return
  }
}

</mosaic_0001>

<bundles_post_ra>
// kernel: tpu_custom_call.1
= control target key start
LH: loop header
LB: loop body
LE: loop exit
PB: predicated region body
PF: predicated region fallthrough
CT: control target
= control target key end

     0   :  { %10 = vsyncpa [#allocation3], 0  ;;  %s1200_s0 = inlined_call_operand.vmem [shape: f32[32,8], index: 0, kind: input, shape index: {}]   ;;  %s1201_s1 = inlined_call_operand.hbm [shape: f32[4,128,128], index: 1, kind: input, shape index: {}]   ;;  %s1202_s2 = inlined_call_operand.vmem [shape: f32[10,128], index: 2, kind: input, shape index: {}]   ;;  %s1203_s3 = inlined_call_operand.hbm [shape: f32[32,128], index: 3, kind: output, shape index: {0}]   ;;  %s1204_s4 = inlined_call_operand.hbm [shape: f32[1,128], index: 4, kind: output, shape index: {1}]  }
   0x1   :  { %11 = vsyncpa [#allocation4], 0 }
   0x2   :  { %12 = vsyncpa [#allocation7], 0  ;;  %s1077_s15 = smov [#allocation2]   ;;  %s1005_s19 = scalar_lea.hbm %s1201_s1, 8192 }
   0x3   :  { %s20_s16 = sshll.u32 %s1077_s15, 4  ;;  %p1006_p0 = scmp.ne.s32.totalorder %s1201_s1, %s1005_s19  ;;  %s21_s16 = int_to_ptr.vmem [resolvable:$true] %s20_s16 }
   0x4   :  { %p1009_p1 = scmp.lt.u32.totalorder %s1005_s19, %s1201_s1 }
   0x6   :  { %p1011_p2 = pnand %p1009_p1, %p1006_p0 }
   0x8   :  { %1014 = shalt.err (!%p1011_p2)
}
   0x9   :  { %s1015_s24 = scalar_lea.vmem %s21_s16, 8192  ;;  %p1020_p4 = scmp.lt.s32.totalorder %s21_s16, %s21_s16 }
   0xa   :  { %p1016_p3 = scmp.ne.s32.totalorder %s21_s16, %s1015_s24  ;;  %p1021_p5 = scmp.lt.s32.totalorder %s1015_s24, %s1015_s24 }
   0xc   :  { %p1022_p6 = por %p1021_p5, %p1020_p4 }
   0xe   :  { %p1023_p7 = pnand %p1022_p6, %p1016_p3 }
  0x10   :  { %1026 = shalt.err (!%p1023_p7)
}
  0x11   :  { %s1078_s25 = smov 128   ;;  %s1079_s26 = smov 8  }
  0x12   :  { %26 = dma.hbm_to_vmem [thread:$0]  %s1201_s1, 8192, %s21_s16, [#allocation3], %s1078_s25, %s1078_s25, %s1079_s26  }
  0x13   :  { %1071 = dma.done.wait [#allocation3], 8192  }
  0x14   :  { %1072 = vsyncadd [#allocation3], 4294959104  ;;  %vm44_vm0 = vcmask 64512   ;;  %v36_v0 = vld [vmem:[#allocation2] sm:$0xff]  ;;  %v32_v1 = vld [vmem:[%s1200_s0] sm:$0xff]  ;;  %s1080_s5 = smov [#allocation5]  }
  0x15   :  { %v33_v2 = vld [vmem:[%s1200_s0 + $0x8] sm:$0xff]  ;;  %759 = vmatprep.subr.mxu0 %v36_v0  ;;  %761 = vmatprep.mubr.msk.f32.mxu0 %vm44_vm0, %v32_v1  ;;  %v34_v3 = vld [vmem:[%s1200_s0 + $0x10] sm:$0xff]  ;;  %v35_v4 = vld [vmem:[%s1200_s0 + $0x18] sm:$0xff]  ;;  %s660_s6 = sshll.u32 %s1080_s5, 4  ;;  %s661_s6 = int_to_ptr.vmem [resolvable:$true] %s660_s6 }
  0x16   :  { %760 = vmatpush3.msra.mxu0 %v36_v0  ;;  %v198_v5 = vld [vmem:[#allocation2 + $0x80] sm:$0xff]  ;;  %v199_v6 = vld [vmem:[#allocation2 + $0x88] sm:$0xff]  ;;  %v200_v8 = vld [vmem:[#allocation2 + $0x90] sm:$0xff]  ;;  %p1032_p9 = scmp.lt.s32.totalorder %s661_s6, %s661_s6 }
  0x17   :  { %762 = vmatmul.mubr.msk.f32.vlgmr.msra.gmra.mrb[0].mxu0 %vm44_vm0, %v33_v2  ;;  %v881_v7 = vpack.c.bf16 %v199_v6, %v198_v5  ;;  %v201_v9 = vld [vmem:[#allocation2 + $0x98] sm:$0xff]  ;;  %v202_v11 = vld [vmem:[#allocation2 + $0xa0] sm:$0xff]  ;;  %v203_v12 = vld [vmem:[#allocation2 + $0xa8] sm:$0xff] }
  0x18   :  { %764 = vmatprep.mubr.msk.f32.mxu0 %vm44_vm0, %v34_v3  ;;  %v885_v10 = vpack.c.bf16 %v201_v9, %v200_v8  ;;  %v204_v13 = vld [vmem:[#allocation2 + $0xb0] sm:$0xff]  ;;  %v889_v14 = vpack.c.bf16 %v203_v12, %v202_v11  ;;  %v205_v15 = vld [vmem:[#allocation2 + $0xb8] sm:$0xff]  ;;  %v206_v17 = vld [vmem:[#allocation2 + $0xc0] sm:$0xff]  ;;  %v181_v9 = vlaneseq }
  0x19   :  { %882 = vmatprep.subr.bf16.mxu1 %v881_v7  ;;  %v893_v16 = vpack.c.bf16 %v205_v15, %v204_v13  ;;  %v207_v18 = vld [vmem:[#allocation2 + $0xc8] sm:$0xff]  ;;  %v208_v20 = vld [vmem:[#allocation2 + $0xd0] sm:$0xff]  ;;  %v209_v21 = vld [vmem:[#allocation2 + $0xd8] sm:$0xff] }
  0x1a   :  { %884 = vmatpush3.bf16.msra.mxu1 %v881_v7  ;;  %v897_v19 = vpack.c.bf16 %v207_v18, %v206_v17  ;;  %v901_v22 = vpack.c.bf16 %v209_v21, %v208_v20  ;;  %v210_v23 = vld [vmem:[#allocation2 + $0xe0] sm:$0xff]  ;;  %v211_v24 = vld [vmem:[#allocation2 + $0xe8] sm:$0xff]  ;;  %v212_v26 = vld [vmem:[#allocation2 + $0xf0] sm:$0xff] }
  0x1b   :  { %765 = vmatmul.mubr.msk.f32.gmra.mrb[2].mxu0 %vm44_vm0, %v35_v4  ;;  %886 = vmatprep.subr.bf16.mxu1 %v885_v10  ;;  %v905_v25 = vpack.c.bf16 %v211_v24, %v210_v23  ;;  %v213_v27 = vld [vmem:[#allocation2 + $0xf8] sm:$0xff]  ;;  %v686_v29 = vld [vmem:[%s1202_s2] ss:$0 sm:$0xff]  ;;  %v38_v11 = vld [vmem:[%s1202_s2 + $0x1] sm:$0x1] }
  0x1c   :  { %v909_v28 = vpack.c.bf16 %v213_v27, %v212_v26  ;;  %v39_v15 = vld [vmem:[%s1202_s2 + $0x2] sm:$0x1] }
  0x1e   :  { %888 = vmatpush3.bf16.msra.mxu1 %v885_v10  ;;  %v182_v10 = vshrl.u32 %v181_v9, 7 }
  0x1f   :  { %890 = vmatprep.subr.bf16.mxu1 %v889_v14 }
  0x20   :  { %v1141_v12 = vsub.s32 0, %v182_v10 }
  0x22   :  { %892 = vmatpush3.bf16.msra.mxu1 %v889_v14 }
  0x23   :  { %894 = vmatprep.subr.bf16.mxu1 %v893_v16 }
  0x26   :  { %896 = vmatpush3.bf16.msra.mxu1 %v893_v16 }
  0x27   :  { %898 = vmatprep.subr.bf16.mxu1 %v897_v19 }
  0x2a   :  { %900 = vmatpush3.bf16.msra.mxu1 %v897_v19 }
  0x2b   :  { %902 = vmatprep.subr.bf16.mxu1 %v901_v22 }
  0x2e   :  { %904 = vmatpush3.bf16.msra.mxu1 %v901_v22 }
  0x2f   :  { %906 = vmatprep.subr.bf16.mxu1 %v905_v25 }
  0x32   :  { %908 = vmatpush3.bf16.msra.mxu1 %v905_v25 }
  0x33   :  { %910 = vmatprep.subr.bf16.mxu1 %v909_v28 }
  0x36   :  { %912 = vmatpush3.bf16.msra.mxu1 %v909_v28  ;;  %v362_v28 = vld [vmem:[#allocation2 + $0x100] sm:$0xff] }
  0xea   :  { %v763_v30 = vpop.f32.mrb[0].mxu0 }
  0xeb   :  { %v129_v31 = vadd.f32 %v763_v30, %v686_v29  ;;  %v123_v32 = vpop.f32.mrb[1].mxu0 }
  0xec   :  { %v124_v33 = vadd.f32 %v686_v29, %v123_v32  ;;  %v365_v32 = vld [vmem:[#allocation2 + $0x118] sm:$0xff] }
  0xed   :  { %v143_v34 = vmul.f32 0.2, %v129_v31 }
  0xee   :  { %v142_v35 = vmul.f32 0.2, %v124_v33  ;;  %v766_v36 = vpop.f32.mrb[2].mxu0 }
  0xef   :  { %v147_v37 = vmax.f32 %v129_v31, %v143_v34  ;;  %v139_v38 = vadd.f32 %v766_v36, %v686_v29  ;;  %v133_v39 = vpop.f32.mrb[3].mxu0  ;;  %v364_v31 = vld [vmem:[#allocation2 + $0x110] sm:$0xff]  ;;  %v366_v34 = vld [vmem:[#allocation2 + $0x120] sm:$0xff] }
  0xf0   :  { %v146_v40 = vmax.f32 %v124_v33, %v142_v35  ;;  %v134_v41 = vadd.f32 %v686_v29, %v133_v39  ;;  %v363_v29 = vld [vmem:[#allocation2 + $0x108] sm:$0xff]  ;;  %v917_v33 = vpack.c.bf16 %v365_v32, %v364_v31  ;;  %v370_v39 = vld [vmem:[#allocation2 + $0x140] sm:$0xff] }
  0xf1   :  { %v160_v42 = vmul.f32 %v147_v37, %v147_v37  ;;  %v145_v43 = vmul.f32 0.2, %v139_v38  ;;  %v913_v30 = vpack.c.bf16 %v363_v29, %v362_v28  ;;  %v367_v35 = vld [vmem:[#allocation2 + $0x128] sm:$0xff] }
  0xf2   :  { %v150_v44 = vadd.f32 %v147_v37, %v146_v40  ;;  %v159_v45 = vmul.f32 %v146_v40, %v146_v40  ;;  %v144_v46 = vmul.f32 0.2, %v134_v41  ;;  %v921_v36 = vpack.c.bf16 %v367_v35, %v366_v34 }
  0xf3   :  { %v149_v48 = vmax.f32 %v139_v38, %v145_v43  ;;  %914 = vmatprep.subr.bf16.mxu0 %v913_v30  ;;  %v369_v38 = vld [vmem:[#allocation2 + $0x138] sm:$0xff]  ;;  %v372_v43 = vld [vmem:[#allocation2 + $0x150] sm:$0xff] }
  0xf4   :  { %v163_v47 = vadd.f32 %v160_v42, %v159_v45  ;;  %v148_v49 = vmax.f32 %v134_v41, %v144_v46  ;;  %916 = vmatpush3.bf16.msra.mxu0 %v913_v30  ;;  %v371_v41 = vld [vmem:[#allocation2 + $0x148] sm:$0xff]  ;;  %v374_v46 = vld [vmem:[#allocation2 + $0x160] sm:$0xff] }
  0xf5   :  { %v162_v52 = vmul.f32 %v149_v48, %v149_v48  ;;  %918 = vmatprep.subr.bf16.mxu0 %v917_v33  ;;  %v929_v42 = vpack.c.bf16 %v371_v41, %v370_v39 }
  0xf6   :  { %v151_v50 = vadd.f32 %v150_v44, %v148_v49  ;;  %v161_v51 = vmul.f32 %v148_v49, %v148_v49  ;;  %v373_v44 = vld [vmem:[#allocation2 + $0x158] sm:$0xff] }
  0xf7   :  { %v933_v45 = vpack.c.bf16 %v373_v44, %v372_v43 }
  0xf8   :  { %v152_v53 = vadd.f32 %v151_v50, %v149_v48  ;;  %v164_v54 = vadd.f32 %v163_v47, %v161_v51  ;;  %920 = vmatpush3.bf16.msra.mxu0 %v917_v33  ;;  %v375_v47 = vld [vmem:[#allocation2 + $0x168] sm:$0xff]  ;;  %v377_v50 = vld [vmem:[#allocation2 + $0x178] sm:$0xff]  ;;  %v215_v33 = vld [vmem:[%s1202_s2 + $0x4] sm:$0x1] }
  0xf9   :  { %922 = vmatprep.subr.bf16.mxu0 %v921_v36 }
  0xfa   :  { %v153_v55 = vrot.slane %v152_v53, 4  ;;  %v165_v56 = vadd.f32 %v164_v54, %v162_v52  ;;  %v691_v52 = vld [vmem:[%s1202_s2 + $0x3] ss:$0 sm:$0xff] }
  0xfc   :  { %v154_v57 = vadd.f32 %v153_v55, %v152_v53  ;;  %v166_v58 = vrot.slane %v165_v56, 4  ;;  %924 = vmatpush3.bf16.msra.mxu0 %v921_v36  ;;  %v216_v36 = vld [vmem:[%s1202_s2 + $0x5] sm:$0x1] }
  0xfe   :  { %v155_v59 = vrot.slane %v154_v57, 2  ;;  %v167_v60 = vadd.f32 %v166_v58, %v165_v56 }
 0x100   :  { %v156_v61 = vadd.f32 %v155_v59, %v154_v57  ;;  %v168_v62 = vrot.slane %v167_v60, 2 }
 0x102   :  { %v157_v63 = vrot.slane %v156_v61, 1  ;;  %v169_v0 = vadd.f32 %v168_v62, %v167_v60 }
 0x104   :  { %v170_v1 = vrot.slane %v169_v0, 1  ;;  %v158_v2 = vadd.f32 %v157_v63, %v156_v61 }
 0x106   :  { %v171_v3 = vadd.f32 %v170_v1, %v169_v0  ;;  %v172_v4 = vmul.f32 0.03125, %v158_v2 }
 0x108   :  { %v173_v5 = vmul.f32 0.03125, %v171_v3  ;;  %v174_v6 = vmul.f32 %v172_v4, %v172_v4 }
 0x10a   :  { %v175_v7 = vsub.f32 %v173_v5, %v174_v6 }
 0x10c   :  { %v176_v8 = vadd.f32 1e-05, %v175_v7 }
 0x10e   :  { %999 = vrsqrt.f32 %v176_v8 }
 0x118   :  { %v1000_v13 = vpop.eup %999 }
 0x119   :  { %v178_v14 = vmul.f32 %v1000_v13, %v38_v11 }
 0x11b   :  { %v179_v16 = vmul.f32 %v178_v14, %v172_v4  ;;  %v184_v17 = vrot.slane %v178_v14, %v1141_v12 }
 0x11d   :  { %v180_v18 = vsub.f32 %v39_v15, %v179_v16  ;;  %v185_v19 = vmul.f32 %v184_v17, %v146_v40  ;;  %v186_v20 = vmul.f32 %v184_v17, %v147_v37  ;;  %v187_v21 = vmul.f32 %v184_v17, %v148_v49  ;;  %v368_v37 = vld [vmem:[#allocation2 + $0x130] sm:$0xff] }
 0x11e   :  { %v188_v22 = vmul.f32 %v184_v17, %v149_v48  ;;  %v925_v40 = vpack.c.bf16 %v369_v38, %v368_v37  ;;  %v937_v48 = vpack.c.bf16 %v375_v47, %v374_v46  ;;  %v376_v49 = vld [vmem:[#allocation2 + $0x170] sm:$0xff] }
 0x11f   :  { %v192_v23 = vrot.slane %v180_v18, %v1141_v12  ;;  %v941_v51 = vpack.c.bf16 %v377_v50, %v376_v49  ;;  %v526_v49 = vld [vmem:[#allocation2 + $0x180] sm:$0xff]  ;;  %v527_v50 = vld [vmem:[#allocation2 + $0x188] sm:$0xff] }
 0x120   :  { %926 = vmatprep.subr.bf16.mxu0 %v925_v40 }
 0x121   :  { %v193_v24 = vadd.f32 %v192_v23, %v185_v19  ;;  %v194_v25 = vadd.f32 %v192_v23, %v186_v20  ;;  %v195_v26 = vadd.f32 %v192_v23, %v187_v21  ;;  %v196_v27 = vadd.f32 %v192_v23, %v188_v22  ;;  %928 = vmatpush3.bf16.msra.mxu0 %v925_v40 }
 0x122   :  { %930 = vmatprep.subr.bf16.mxu0 %v929_v42 }
 0x123   :  { %799 = vmatprep.mubr.f32.mxu1 %v193_v24 }
 0x124   :  { %800 = vmatmul.mubr.f32.vlgmr.msra.gmra.mrb[0].mxu1 %v194_v25 }
 0x125   :  { %802 = vmatprep.mubr.f32.mxu1 %v195_v26  ;;  %932 = vmatpush3.bf16.msra.mxu0 %v929_v42 }
 0x126   :  { %934 = vmatprep.subr.bf16.mxu0 %v933_v45 }
 0x128   :  { %803 = vmatmul.mubr.f32.gmra.mrb[2].mxu1 %v196_v27 }
 0x129   :  { %936 = vmatpush3.bf16.msra.mxu0 %v933_v45 }
 0x12a   :  { %938 = vmatprep.subr.bf16.mxu0 %v937_v48 }
 0x12d   :  { %940 = vmatpush3.bf16.msra.mxu0 %v937_v48 }
 0x12e   :  { %942 = vmatprep.subr.bf16.mxu0 %v941_v51 }
 0x131   :  { %944 = vmatpush3.bf16.msra.mxu0 %v941_v51  ;;  %v945_v51 = vpack.c.bf16 %v527_v50, %v526_v49 }
 0x133   :  { %946 = vmatprep.subr.bf16.mxu0 %v945_v51  ;;  %977 = vmatprep.subr.bf16.mxu1 %v945_v51 }
 0x134   :  { %985 = vmatpush3.bf16.msra.mxu1 %v945_v51 }
 0x1f7   :  { %v801_v53 = vpop.f32.mrb[0].mxu1 }
 0x1f8   :  { %v293_v54 = vadd.f32 %v801_v53, %v691_v52  ;;  %v287_v55 = vpop.f32.mrb[1].mxu1  ;;  %v529_v53 = vld [vmem:[#allocation2 + $0x198] sm:$0xff] }
 0x1f9   :  { %v288_v56 = vadd.f32 %v691_v52, %v287_v55  ;;  %v530_v55 = vld [vmem:[#allocation2 + $0x1a0] sm:$0xff] }
 0x1fa   :  { %v307_v57 = vmul.f32 0.2, %v293_v54 }
 0x1fb   :  { %v306_v58 = vmul.f32 0.2, %v288_v56  ;;  %v804_v59 = vpop.f32.mrb[2].mxu1 }
 0x1fc   :  { %v311_v60 = vmax.f32 %v293_v54, %v307_v57  ;;  %v303_v61 = vadd.f32 %v804_v59, %v691_v52  ;;  %v297_v62 = vpop.f32.mrb[3].mxu1  ;;  %v533_v59 = vld [vmem:[#allocation2 + $0x1b8] sm:$0xff] }
 0x1fd   :  { %v310_v63 = vmax.f32 %v288_v56, %v306_v58  ;;  %v298_v0 = vadd.f32 %v691_v52, %v297_v62  ;;  %v528_v52 = vld [vmem:[#allocation2 + $0x190] sm:$0xff]  ;;  %v531_v56 = vld [vmem:[#allocation2 + $0x1a8] sm:$0xff] }
 0x1fe   :  { %v324_v1 = vmul.f32 %v311_v60, %v311_v60  ;;  %v309_v2 = vmul.f32 0.2, %v303_v61  ;;  %v949_v54 = vpack.c.bf16 %v529_v53, %v528_v52  ;;  %v953_v57 = vpack.c.bf16 %v531_v56, %v530_v55  ;;  %v532_v58 = vld [vmem:[#allocation2 + $0x1b0] sm:$0xff]  ;;  %v535_v62 = vld [vmem:[#allocation2 + $0x1c8] sm:$0xff] }
 0x1ff   :  { %v314_v3 = vadd.f32 %v311_v60, %v310_v63  ;;  %v323_v4 = vmul.f32 %v310_v63, %v310_v63  ;;  %v308_v5 = vmul.f32 0.2, %v298_v0 }
 0x200   :  { %v313_v7 = vmax.f32 %v303_v61, %v309_v2  ;;  %978 = vmatprep.subr.bf16.mxu1 %v949_v54  ;;  %v957_v61 = vpack.c.bf16 %v533_v59, %v532_v58 }
 0x201   :  { %v327_v6 = vadd.f32 %v324_v1, %v323_v4  ;;  %v312_v8 = vmax.f32 %v298_v0, %v308_v5  ;;  %986 = vmatpush3.bf16.msra.mxu1 %v949_v54  ;;  %v536_v0 = vld [vmem:[#allocation2 + $0x1d0] sm:$0xff]  ;;  %v537_v1 = vld [vmem:[#allocation2 + $0x1d8] sm:$0xff]  ;;  %v539_v4 = vld [vmem:[#allocation2 + $0x1e8] sm:$0xff] }
 0x202   :  { %v326_v11 = vmul.f32 %v313_v7, %v313_v7  ;;  %979 = vmatprep.subr.bf16.mxu1 %v953_v57  ;;  %v965_v2 = vpack.c.bf16 %v537_v1, %v536_v0 }
 0x203   :  { %v315_v9 = vadd.f32 %v314_v3, %v312_v8  ;;  %v325_v10 = vmul.f32 %v312_v8, %v312_v8  ;;  %v538_v3 = vld [vmem:[#allocation2 + $0x1e0] sm:$0xff] }
 0x204   :  { %v969_v5 = vpack.c.bf16 %v539_v4, %v538_v3 }
 0x205   :  { %v316_v13 = vadd.f32 %v315_v9, %v313_v7  ;;  %v328_v14 = vadd.f32 %v327_v6, %v325_v10  ;;  %987 = vmatpush3.bf16.msra.mxu1 %v953_v57  ;;  %v540_v6 = vld [vmem:[#allocation2 + $0x1f0] sm:$0xff] }
 0x206   :  { %980 = vmatprep.subr.bf16.mxu1 %v957_v61  ;;  %v692_v9 = vld [vmem:[%s1202_s2 + $0x6] ss:$0 sm:$0xff] }
 0x207   :  { %v317_v15 = vrot.slane %v316_v13, 4  ;;  %v329_v16 = vadd.f32 %v328_v14, %v326_v11 }
 0x209   :  { %v318_v17 = vadd.f32 %v317_v15, %v316_v13  ;;  %v330_v18 = vrot.slane %v329_v16, 4  ;;  %988 = vmatpush3.bf16.msra.mxu1 %v957_v61 }
 0x20b   :  { %v319_v19 = vrot.slane %v318_v17, 2  ;;  %v331_v20 = vadd.f32 %v330_v18, %v329_v16 }
 0x20d   :  { %v320_v21 = vadd.f32 %v319_v19, %v318_v17  ;;  %v332_v22 = vrot.slane %v331_v20, 2 }
 0x20f   :  { %v321_v23 = vrot.slane %v320_v21, 1  ;;  %v333_v24 = vadd.f32 %v332_v22, %v331_v20 }
 0x211   :  { %v322_v25 = vadd.f32 %v321_v23, %v320_v21  ;;  %v334_v26 = vrot.slane %v333_v24, 1 }
 0x213   :  { %v335_v27 = vadd.f32 %v334_v26, %v333_v24  ;;  %v336_v28 = vmul.f32 0.03125, %v322_v25 }
 0x215   :  { %v337_v29 = vmul.f32 0.03125, %v335_v27  ;;  %v338_v30 = vmul.f32 %v336_v28, %v336_v28 }
 0x217   :  { %v339_v31 = vsub.f32 %v337_v29, %v338_v30 }
 0x219   :  { %v340_v32 = vadd.f32 1e-05, %v339_v31 }
 0x21b   :  { %1001 = vrsqrt.f32 %v340_v32 }
 0x225   :  { %v1002_v34 = vpop.eup %1001 }
 0x226   :  { %v342_v35 = vmul.f32 %v1002_v34, %v215_v33 }
 0x228   :  { %v343_v37 = vmul.f32 %v342_v35, %v336_v28  ;;  %v348_v38 = vrot.slane %v342_v35, %v1141_v12 }
 0x22a   :  { %v344_v39 = vsub.f32 %v216_v36, %v343_v37  ;;  %v349_v40 = vmul.f32 %v348_v38, %v310_v63  ;;  %v350_v41 = vmul.f32 %v348_v38, %v311_v60  ;;  %v351_v42 = vmul.f32 %v348_v38, %v312_v8  ;;  %v534_v60 = vld [vmem:[#allocation2 + $0x1c0] sm:$0xff] }
 0x22b   :  { %v352_v43 = vmul.f32 %v348_v38, %v313_v7  ;;  %v961_v63 = vpack.c.bf16 %v535_v62, %v534_v60  ;;  %v541_v7 = vld [vmem:[#allocation2 + $0x1f8] sm:$0xff] }
 0x22c   :  { %v356_v44 = vrot.slane %v344_v39, %v1141_v12  ;;  %v973_v8 = vpack.c.bf16 %v541_v7, %v540_v6  ;;  %v693_v6 = vld [vmem:[%s1202_s2 + $0x9] ss:$0 sm:$0xff] }
 0x22d   :  { %981 = vmatprep.subr.bf16.mxu1 %v961_v63 }
 0x22e   :  { %v357_v45 = vadd.f32 %v356_v44, %v349_v40  ;;  %v358_v46 = vadd.f32 %v356_v44, %v350_v41  ;;  %v359_v47 = vadd.f32 %v356_v44, %v351_v42  ;;  %v360_v48 = vadd.f32 %v356_v44, %v352_v43  ;;  %989 = vmatpush3.bf16.msra.mxu1 %v961_v63 }
 0x22f   :  { %982 = vmatprep.subr.bf16.mxu1 %v965_v2 }
 0x230   :  { %837 = vmatprep.mubr.f32.mxu0 %v357_v45 }
 0x231   :  { %838 = vmatmul.mubr.f32.vlgmr.msra.gmra.mrb[4].mxu0 %v358_v46 }
 0x232   :  { %840 = vmatprep.mubr.f32.mxu0 %v359_v47  ;;  %948 = vmatpush3.bf16.msra.mxu0 %v945_v51 }
 0x233   :  { %950 = vmatprep.subr.bf16.mxu0 %v949_v54  ;;  %990 = vmatpush3.bf16.msra.mxu1 %v965_v2 }
 0x234   :  { %983 = vmatprep.subr.bf16.mxu1 %v969_v5 }
 0x235   :  { %841 = vmatmul.mubr.f32.gmra.mrb[6].mxu0 %v360_v48 }
 0x236   :  { %952 = vmatpush3.bf16.msra.mxu0 %v949_v54  ;;  %v379_v54 = vld [vmem:[%s1202_s2 + $0x7] sm:$0x1] }
 0x237   :  { %954 = vmatprep.subr.bf16.mxu0 %v953_v57  ;;  %991 = vmatpush3.bf16.msra.mxu1 %v969_v5 }
 0x238   :  { %984 = vmatprep.subr.bf16.mxu1 %v973_v8 }
 0x23a   :  { %956 = vmatpush3.bf16.msra.mxu0 %v953_v57  ;;  %v380_v57 = vld [vmem:[%s1202_s2 + $0x8] sm:$0x1]  ;;  %s1027_s2 = scalar_lea.vmem %s661_s6, 512 }
 0x23b   :  { %958 = vmatprep.subr.bf16.mxu0 %v957_v61  ;;  %992 = vmatpush3.bf16.msra.mxu1 %v973_v8  ;;  %p1028_p8 = scmp.ne.s32.totalorder %s661_s6, %s1027_s2  ;;  %p1033_p10 = scmp.lt.s32.totalorder %s1027_s2, %s1027_s2 }
 0x23d   :  { %p1034_p11 = por %p1033_p10, %p1032_p9 }
 0x23e   :  { %960 = vmatpush3.bf16.msra.mxu0 %v957_v61 }
 0x23f   :  { %962 = vmatprep.subr.bf16.mxu0 %v961_v63  ;;  %p1035_p12 = pnand %p1034_p11, %p1028_p8 }
 0x242   :  { %964 = vmatpush3.bf16.msra.mxu0 %v961_v63 }
 0x243   :  { %966 = vmatprep.subr.bf16.mxu0 %v965_v2 }
 0x246   :  { %968 = vmatpush3.bf16.msra.mxu0 %v965_v2 }
 0x247   :  { %970 = vmatprep.subr.bf16.mxu0 %v969_v5 }
 0x24a   :  { %972 = vmatpush3.bf16.msra.mxu0 %v969_v5 }
 0x24b   :  { %974 = vmatprep.subr.bf16.mxu0 %v973_v8 }
 0x24e   :  { %976 = vmatpush3.bf16.msra.mxu0 %v973_v8 }
 0x304   :  { %v839_v10 = vpop.f32.mrb[4].mxu0 }
 0x305   :  { %v457_v11 = vadd.f32 %v839_v10, %v692_v9  ;;  %v451_v13 = vpop.f32.mrb[5].mxu0 }
 0x306   :  { %v452_v14 = vadd.f32 %v692_v9, %v451_v13 }
 0x307   :  { %v471_v15 = vmul.f32 0.2, %v457_v11 }
 0x308   :  { %v470_v16 = vmul.f32 0.2, %v452_v14  ;;  %v842_v17 = vpop.f32.mrb[6].mxu0 }
 0x309   :  { %v475_v18 = vmax.f32 %v457_v11, %v471_v15  ;;  %v467_v19 = vadd.f32 %v842_v17, %v692_v9  ;;  %v461_v20 = vpop.f32.mrb[7].mxu0  ;;  %v1081_v15 = vmov 0.0  }
 0x30a   :  { %v474_v21 = vmax.f32 %v452_v14, %v470_v16  ;;  %v462_v22 = vadd.f32 %v692_v9, %v461_v20 }
 0x30b   :  { %v488_v23 = vmul.f32 %v475_v18, %v475_v18  ;;  %v473_v24 = vmul.f32 0.2, %v467_v19 }
 0x30c   :  { %v478_v25 = vadd.f32 %v475_v18, %v474_v21  ;;  %v487_v26 = vmul.f32 %v474_v21, %v474_v21  ;;  %v472_v27 = vmul.f32 0.2, %v462_v22 }
 0x30d   :  { %v477_v29 = vmax.f32 %v467_v19, %v473_v24 }
 0x30e   :  { %v491_v28 = vadd.f32 %v488_v23, %v487_v26  ;;  %v476_v30 = vmax.f32 %v462_v22, %v472_v27 }
 0x30f   :  { %v490_v33 = vmul.f32 %v477_v29, %v477_v29 }
 0x310   :  { %v479_v31 = vadd.f32 %v478_v25, %v476_v30  ;;  %v489_v32 = vmul.f32 %v476_v30, %v476_v30 }
 0x312   :  { %v480_v34 = vadd.f32 %v479_v31, %v477_v29  ;;  %v492_v35 = vadd.f32 %v491_v28, %v489_v32 }
 0x314   :  { %v481_v36 = vrot.slane %v480_v34, 4  ;;  %v493_v37 = vadd.f32 %v492_v35, %v490_v33 }
 0x316   :  { %v482_v38 = vadd.f32 %v481_v36, %v480_v34  ;;  %v494_v39 = vrot.slane %v493_v37, 4 }
 0x318   :  { %v483_v40 = vrot.slane %v482_v38, 2  ;;  %v495_v41 = vadd.f32 %v494_v39, %v493_v37 }
 0x31a   :  { %v484_v42 = vadd.f32 %v483_v40, %v482_v38  ;;  %v496_v43 = vrot.slane %v495_v41, 2 }
 0x31c   :  { %v485_v44 = vrot.slane %v484_v42, 1  ;;  %v497_v45 = vadd.f32 %v496_v43, %v495_v41 }
 0x31e   :  { %v486_v46 = vadd.f32 %v485_v44, %v484_v42  ;;  %v498_v47 = vrot.slane %v497_v45, 1 }
 0x320   :  { %v499_v48 = vadd.f32 %v498_v47, %v497_v45  ;;  %v500_v49 = vmul.f32 0.03125, %v486_v46 }
 0x322   :  { %v501_v50 = vmul.f32 0.03125, %v499_v48  ;;  %v502_v51 = vmul.f32 %v500_v49, %v500_v49 }
 0x324   :  { %v503_v52 = vsub.f32 %v501_v50, %v502_v51 }
 0x326   :  { %v504_v53 = vadd.f32 1e-05, %v503_v52 }
 0x328   :  { %1003 = vrsqrt.f32 %v504_v53 }
 0x332   :  { %v1004_v55 = vpop.eup %1003 }
 0x333   :  { %v506_v56 = vmul.f32 %v1004_v55, %v379_v54 }
 0x335   :  { %v507_v58 = vmul.f32 %v506_v56, %v500_v49  ;;  %v512_v59 = vrot.slane %v506_v56, %v1141_v12 }
 0x337   :  { %v508_v60 = vsub.f32 %v380_v57, %v507_v58  ;;  %v513_v61 = vmul.f32 %v512_v59, %v474_v21  ;;  %v515_v62 = vmul.f32 %v512_v59, %v476_v30  ;;  %v514_v63 = vmul.f32 %v512_v59, %v475_v18 }
 0x338   :  { %v516_v0 = vmul.f32 %v512_v59, %v477_v29 }
 0x339   :  { %v520_v1 = vrot.slane %v508_v60, %v1141_v12 }
 0x33b   :  { %v521_v2 = vadd.f32 %v520_v1, %v513_v61  ;;  %v523_v3 = vadd.f32 %v520_v1, %v515_v62  ;;  %v522_v4 = vadd.f32 %v520_v1, %v514_v63  ;;  %v524_v5 = vadd.f32 %v520_v1, %v516_v0 }
 0x33d   :  { %875 = vmatprep.mubr.f32.mxu0 %v521_v2  ;;  %878 = vmatprep.mubr.f32.mxu1 %v523_v3 }
 0x33e   :  { %876 = vmatmul.mubr.f32.vlgmr.msra.gmra.mrb[8].mxu0 %v522_v4  ;;  %879 = vmatmul.mubr.f32.vlgmr.msra.gmra.mrb[4].mxu1 %v524_v5 }
 0x411   :  { %v877_v7 = vpop.f32.mrb[8].mxu0  ;;  %v880_v8 = vpop.f32.mrb[4].mxu1 }
 0x412   :  { %v619_v9 = vadd.f32 %v877_v7, %v693_v6  ;;  %v629_v10 = vadd.f32 %v880_v8, %v693_v6  ;;  %v613_v11 = vpop.f32.mrb[9].mxu0  ;;  %v623_v13 = vpop.f32.mrb[5].mxu1 }
 0x413   :  { %v614_v14 = vadd.f32 %v693_v6, %v613_v11  ;;  %v624_v12 = vadd.f32 %v693_v6, %v623_v13 }
 0x414   :  { %vm644_vm1 = vcmp.gt.f32.partialorder %v619_v9, 0.0  ;;  %vm646_vm2 = vcmp.gt.f32.partialorder %v629_v10, 0.0 }
 0x415   :  { %v648_v16 = vsel %vm644_vm1, 1.0, %v1081_v15  ;;  %v650_v17 = vsel %vm646_vm2, 1.0, %v1081_v15  ;;  %v632_v18 = vadd.f32 %v619_v9, %v614_v14  ;;  %vm643_vm3 = vcmp.gt.f32.partialorder %v614_v14, 0.0 }
 0x416   :  { %652 = vst [vmem:[#allocation5 + $0x8] sm:$0xff] %v648_v16  ;;  %654 = vst [vmem:[#allocation5 + $0x18] sm:$0xff] %v650_v17  ;;  %v647_v19 = vsel %vm643_vm3, 1.0, %v1081_v15  ;;  %vm645_vm4 = vcmp.gt.f32.partialorder %v624_v12, 0.0 }
 0x417   :  { %651 = vst [vmem:[#allocation5] sm:$0xff] %v647_v19  ;;  %v633_v20 = vadd.f32 %v632_v18, %v624_v12  ;;  %v649_v21 = vsel %vm645_vm4, 1.0, %v1081_v15 }
 0x418   :  { %653 = vst [vmem:[#allocation5 + $0x10] sm:$0xff] %v649_v21 }
 0x419   :  { %v634_v22 = vadd.f32 %v633_v20, %v629_v10 }
 0x41a   :  { %1038 = shalt.err (!%p1035_p12)
}
 0x41b   :  { %s1039_s1 = scalar_lea.hbm %s1203_s3, 512 }
 0x41c   :  { %p1040_p13 = scmp.ne.s32.totalorder %s1203_s3, %s1039_s1  ;;  %p1043_p0 = scmp.lt.u32.totalorder %s1039_s1, %s1203_s3 }
 0x41e   :  { %p1045_p1 = pnand %p1043_p0, %p1040_p13 }
 0x420   :  { %1048 = shalt.err (!%p1045_p1)
}
 0x421   :  { %666 = dma.vmem_to_hbm [thread:$0]  %s661_s6, 512, %s1203_s3, [#allocation4], %s1078_s25, %s1078_s25, %s1079_s26   ;;  %v635_v23 = vrot.slane %v634_v22, 4 }
 0x422   :  { %s1082_s14 = smov [#allocation6]  }
 0x423   :  { %v636_v24 = vadd.f32 %v635_v23, %v634_v22  ;;  %s673_s15 = sshll.u32 %s1082_s14, 4  ;;  %s674_s15 = int_to_ptr.vmem [resolvable:$true] %s673_s15 }
 0x424   :  { %s1049_s16 = scalar_lea.vmem %s674_s15, 16  ;;  %s1053_s17 = scalar_lea.vmem %s674_s15, 32 }
 0x425   :  { %v637_v25 = vrot.slane %v636_v24, 2  ;;  %p1050_p2 = scmp.ne.s32.totalorder %s674_s15, %s1049_s16  ;;  %p1054_p3 = scmp.lt.s32.totalorder %s674_s15, %s674_s15 }
 0x426   :  { %p1055_p4 = scmp.lt.s32.totalorder %s1053_s17, %s1049_s16 }
 0x427   :  { %v638_v26 = vadd.f32 %v637_v25, %v636_v24 }
 0x428   :  { %p1056_p5 = por %p1055_p4, %p1054_p3 }
 0x429   :  { %v639_v27 = vrot.slane %v638_v26, 1 }
 0x42a   :  { %p1057_p6 = pnand %p1056_p5, %p1050_p2 }
 0x42b   :  { %v640_v28 = vadd.f32 %v639_v27, %v638_v26 }
 0x42d   :  { %v641_v29 = vmul.f32 0.03125, %v640_v28 }
 0x42f   :  { %642 = vst [vmem:[#allocation6] sm:$0x1] %v641_v29 }
 0x430   :  { %1060 = shalt.err (!%p1057_p6)
}
 0x431   :  { %s1061_s26 = scalar_lea.hbm %s1204_s4, 16 }
 0x432   :  { %p1062_p7 = scmp.ne.s32.totalorder %s1204_s4, %s1061_s26  ;;  %p1065_p8 = scmp.lt.u32.totalorder %s1061_s26, %s1204_s4 }
 0x434   :  { %p1067_p9 = pnand %p1065_p8, %p1062_p7 }
 0x436   :  { %1070 = shalt.err (!%p1067_p9)
}
 0x437   :  { %676 = dma.vmem_to_hbm [thread:$0]  %s674_s15, 16, %s1204_s4, [#allocation7]  }
 0x438   :  { %1073 = dma.done.wait [#allocation4], 512  }
 0x439   :  { %1074 = vsyncadd [#allocation4], 4294966784 }
 0x43a   :  { %1075 = dma.done.wait [#allocation7], 16  }
 0x43b   :  { %1076 = vsyncadd [#allocation7], 4294967280 }
 0x43c   :  { %683 = vsyncpa [#allocation3], 1 }
 0x43d   :  { %684 = vsyncpa [#allocation4], 1 }
 0x43e   :  { %685 = vsyncpa [#allocation7], 1 }

</bundles_post_ra>
